<compile_context>
chip_gen: v7x
topology: tpu7x:2x2x1
jax: 0.10.0
libtpu: 0.0.40
codegen_flags: <defaults>
</compile_context>

<pallas_src>
import functools

import jax
import jax.numpy as jnp
from jax.experimental import pallas as pl
from jax.experimental.pallas import tpu as pltpu


def _round_up(x, m):
    return ((x + m - 1) // m) * m


def _mlp_value_kernel(x_ref, w1_ref, b1_ref, w2_ref, b2_ref, w3_ref, b3_ref,
                      out_ref):
    # x_ref: (state_dims, TB)  -- batch on the 128-lane axis.
    x = x_ref[...]

    # Layer 1: (32, state_dims) @ (state_dims, TB) + (32, 1) -> ReLU
    h1 = jnp.dot(w1_ref[...], x, preferred_element_type=jnp.float32)
    h1 = jnp.maximum(h1 + b1_ref[...], 0.0)                  # (32, TB)

    # Layer 2: (32, 32) @ (32, TB) + (32, 1) -> ReLU
    h2 = jnp.dot(w2_ref[...], h1, preferred_element_type=jnp.float32)
    h2 = jnp.maximum(h2 + b2_ref[...], 0.0)                  # (32, TB)

    # Layer 3: (1, 32) @ (32, TB) + scalar bias (from SMEM)
    v = jnp.dot(w3_ref[...], h2, preferred_element_type=jnp.float32)
    out_ref[...] = (v + b3_ref[0]).astype(out_ref.dtype)     # (1, TB)


@functools.partial(jax.jit, static_argnames=("tb",))
def v_approx_forward(states, params, *, tb=1024):
    """Fused MLP value-function forward.

    states: (B, state_dims) float32
    params: PyTorch-layout (W1(32,S), b1(32,1), W2(32,32), b2(32,1),
            W3(1,32), b3(1,1))
    returns (B, 1) float32
    """
    w1, b1, w2, b2, w3, b3 = params
    states = states.astype(jnp.float32)
    B, state_dims = states.shape

    # Batch tile: multiple of 128 lanes, no bigger than needed.
    tb = _round_up(min(tb, B), 128)
    b_pad = _round_up(B, tb)
    if b_pad != B:
        states = jnp.pad(states, ((0, b_pad - B), (0, 0)))

    # Lane-dense layout: batch on the last (lane) axis.
    x_t = states.T                                            # (state_dims, b_pad)
    b3_s = b3.reshape((1,)).astype(jnp.float32)               # scalar bias -> SMEM

    out = pl.pallas_call(
        _mlp_value_kernel,
        out_shape=jax.ShapeDtypeStruct((1, b_pad), jnp.float32),
        grid=(b_pad // tb,),
        in_specs=[
            # Activations: tiled along batch (pipelined DMA).
            pl.BlockSpec((state_dims, tb), lambda i: (0, i)),
            # Weights / biases: constant block -> fetched once, stay resident.
            pl.BlockSpec(w1.shape, lambda i: (0, 0)),
            pl.BlockSpec(b1.shape, lambda i: (0, 0)),
            pl.BlockSpec(w2.shape, lambda i: (0, 0)),
            pl.BlockSpec(b2.shape, lambda i: (0, 0)),
            pl.BlockSpec(w3.shape, lambda i: (0, 0)),
            # Scalar output bias lives in SMEM (no padded VMEM tile).
            pl.BlockSpec(memory_space=pltpu.MemorySpace.SMEM),
        ],
        out_specs=pl.BlockSpec((1, tb), lambda i: (0, i)),
        compiler_params=pltpu.CompilerParams(
            dimension_semantics=("parallel",)),
    )(x_t, w1, b1, w2, b2, w3, b3_s)

    return out[:, :B].T                                       # (B, 1)


def init_params(key, state_dims, hidden=32):
    """PyTorch nn.Linear-style init (uniform +/- 1/sqrt(fan_in)), kept in the
    native (out, in) weight layout; biases as (out, 1); b3 as (1, 1)."""
    ks = jax.random.split(key, 6)

    def linear(kw, kb, fan_in, fan_out):
        bound = 1.0 / jnp.sqrt(jnp.float32(fan_in))
        w = jax.random.uniform(kw, (fan_out, fan_in), jnp.float32, -bound, bound)
        b = jax.random.uniform(kb, (fan_out, 1), jnp.float32, -bound, bound)
        return w, b

    w1, b1 = linear(ks[0], ks[1], state_dims, hidden)
    w2, b2 = linear(ks[2], ks[3], hidden, hidden)
    w3, b3 = linear(ks[4], ks[5], hidden, 1)
    return (w1, b1, w2, b2, w3, b3)


def reference_forward(states, params):
    w1, b1, w2, b2, w3, b3 = params
    h1 = jnp.maximum(states @ w1.T + b1.T, 0.0)
    h2 = jnp.maximum(h1 @ w2.T + b2.T, 0.0)
    return h2 @ w3.T + b3.T


if __name__ == "__main__":
    key = jax.random.PRNGKey(0)
    k_params, k_s1, k_s2 = jax.random.split(key, 3)

    state_dims = 16
    params = init_params(k_params, state_dims)

    # Small case (single grid step, ragged tile padded to 128 lanes).
    batch = 8
    states = jax.random.normal(k_s1, (batch, state_dims), jnp.float32)
    out = jax.block_until_ready(v_approx_forward(states, params))
    ref = reference_forward(states, params)
    assert out.shape == (batch, 1), out.shape
    assert jnp.allclose(out, ref, atol=1e-5, rtol=1e-5)

    # Multi-tile case: exercises pipelined grid + ragged last tile.
    batch2 = 300
    states2 = jax.random.normal(k_s2, (batch2, state_dims), jnp.float32)
    out2 = jax.block_until_ready(v_approx_forward(states2, params, tb=128))
    ref2 = reference_forward(states2, params)
    assert out2.shape == (batch2, 1), out2.shape
    assert jnp.allclose(out2, ref2, atol=1e-5, rtol=1e-5)

    print("KERNEL_OK")
</pallas_src>

<mosaic_0001>
module attributes {stable_mosaic.version = 11 : i64} {
  func.func @_mlp_value_kernel(%arg0: i32, %arg1: memref<16x128xf32, #tpu.memory_space<vmem>>, %arg2: memref<32x16xf32, #tpu.memory_space<vmem>>, %arg3: memref<32x1xf32, #tpu.memory_space<vmem>>, %arg4: memref<32x32xf32, #tpu.memory_space<vmem>>, %arg5: memref<32x1xf32, #tpu.memory_space<vmem>>, %arg6: memref<1x32xf32, #tpu.memory_space<vmem>>, %arg7: memref<1xf32, #tpu.memory_space<smem>>, %arg8: memref<1x128xf32, #tpu.memory_space<vmem>>) attributes {dimension_semantics = [#tpu.dimension_semantics<parallel>], iteration_bounds = array<i64: 1>, scalar_prefetch = 0 : i64, scratch_operands = 0 : i64, tpu.core_type = #tpu.core_type<tc>, window_params = [{transform_indices = @transform_0, window_bounds = array<i64: 16, 128>}, {pipeline_mode = #tpu.pipeline_mode<synchronous>, transform_indices = @transform_1, window_bounds = array<i64: 32, 16>}, {pipeline_mode = #tpu.pipeline_mode<synchronous>, transform_indices = @transform_2, window_bounds = array<i64: 32, 1>}, {pipeline_mode = #tpu.pipeline_mode<synchronous>, transform_indices = @transform_3, window_bounds = array<i64: 32, 32>}, {pipeline_mode = #tpu.pipeline_mode<synchronous>, transform_indices = @transform_4, window_bounds = array<i64: 32, 1>}, {pipeline_mode = #tpu.pipeline_mode<synchronous>, transform_indices = @transform_5, window_bounds = array<i64: 1, 32>}, {transform_indices = @transform_6, window_bounds = array<i64: 1>}, {transform_indices = @transform_7, window_bounds = array<i64: 1, 128>}]} {
    %c0 = arith.constant 0 : index
    %c0_0 = arith.constant 0 : index
    %0 = vector.load %arg1[%c0, %c0_0] : memref<16x128xf32, #tpu.memory_space<vmem>>, vector<16x128xf32>
    %c0_1 = arith.constant 0 : index
    %c0_2 = arith.constant 0 : index
    %1 = vector.load %arg2[%c0_1, %c0_2] : memref<32x16xf32, #tpu.memory_space<vmem>>, vector<32x16xf32>
    %cst = arith.constant dense<0.000000e+00> : vector<32x128xf32>
    %2 = tpu.matmul %1, %0, %cst {dimension_numbers = #tpu.dot_dimension_numbers<[1], [0], [0], [1], [0, 0, 1, 1], [], []>} : vector<32x16xf32>, vector<16x128xf32>, vector<32x128xf32> -> vector<32x128xf32>
    %c0_3 = arith.constant 0 : index
    %c0_4 = arith.constant 0 : index
    %3 = vector.load %arg3[%c0_3, %c0_4] : memref<32x1xf32, #tpu.memory_space<vmem>>, vector<32x1xf32>
    %4 = vector.broadcast %3 : vector<32x1xf32> to vector<32x128xf32>
    %5 = arith.addf %2, %4 : vector<32x128xf32>
    %cst_5 = arith.constant 0.000000e+00 : f32
    %6 = vector.broadcast %cst_5 : f32 to vector<32x128xf32>
    %7 = arith.maximumf %5, %6 : vector<32x128xf32>
    %c0_6 = arith.constant 0 : index
    %c0_7 = arith.constant 0 : index
    %8 = vector.load %arg4[%c0_6, %c0_7] : memref<32x32xf32, #tpu.memory_space<vmem>>, vector<32x32xf32>
    %cst_8 = arith.constant dense<0.000000e+00> : vector<32x128xf32>
    %9 = tpu.matmul %8, %7, %cst_8 {dimension_numbers = #tpu.dot_dimension_numbers<[1], [0], [0], [1], [0, 0, 1, 1], [], []>} : vector<32x32xf32>, vector<32x128xf32>, vector<32x128xf32> -> vector<32x128xf32>
    %c0_9 = arith.constant 0 : index
    %c0_10 = arith.constant 0 : index
    %10 = vector.load %arg5[%c0_9, %c0_10] : memref<32x1xf32, #tpu.memory_space<vmem>>, vector<32x1xf32>
    %11 = vector.broadcast %10 : vector<32x1xf32> to vector<32x128xf32>
    %12 = arith.addf %9, %11 : vector<32x128xf32>
    %cst_11 = arith.constant 0.000000e+00 : f32
    %13 = vector.broadcast %cst_11 : f32 to vector<32x128xf32>
    %14 = arith.maximumf %12, %13 : vector<32x128xf32>
    %c0_12 = arith.constant 0 : index
    %c0_13 = arith.constant 0 : index
    %15 = vector.load %arg6[%c0_12, %c0_13] : memref<1x32xf32, #tpu.memory_space<vmem>>, vector<1x32xf32>
    %cst_14 = arith.constant dense<0.000000e+00> : vector<1x128xf32>
    %16 = tpu.matmul %15, %14, %cst_14 {dimension_numbers = #tpu.dot_dimension_numbers<[1], [0], [0], [1], [0, 0, 1, 1], [], []>} : vector<1x32xf32>, vector<32x128xf32>, vector<1x128xf32> -> vector<1x128xf32>
    %c0_15 = arith.constant 0 : index
    %17 = memref.load %arg7[%c0_15] : memref<1xf32, #tpu.memory_space<smem>>
    %18 = vector.broadcast %17 : f32 to vector<1x128xf32>
    %19 = arith.addf %16, %18 : vector<1x128xf32>
    %c0_16 = arith.constant 0 : index
    %c0_17 = arith.constant 0 : index
    %20 = vector.load %arg8[%c0_16, %c0_17] : memref<1x128xf32, #tpu.memory_space<vmem>>, vector<1x128xf32>
    tpu.vector_store %arg8[%c0_16, %c0_17], %19 {strides = array<i32>} : memref<1x128xf32, #tpu.memory_space<vmem>>, vector<1x128xf32>,
    return
  }
  func.func @transform_0(%arg0: i32) -> (i32, i32) {
    %c0_i32 = arith.constant 0 : i32
    %c0_i32_0 = arith.constant 0 : i32
    return %c0_i32, %arg0 : i32, i32
  }
  func.func @transform_1(%arg0: i32) -> (i32, i32) {
    %c0_i32 = arith.constant 0 : i32
    %c0_i32_0 = arith.constant 0 : i32
    %c0_i32_1 = arith.constant 0 : i32
    return %c0_i32, %c0_i32_0 : i32, i32
  }
  func.func @transform_2(%arg0: i32) -> (i32, i32) {
    %c0_i32 = arith.constant 0 : i32
    %c0_i32_0 = arith.constant 0 : i32
    %c0_i32_1 = arith.constant 0 : i32
    return %c0_i32, %c0_i32_0 : i32, i32
  }
  func.func @transform_3(%arg0: i32) -> (i32, i32) {
    %c0_i32 = arith.constant 0 : i32
    %c0_i32_0 = arith.constant 0 : i32
    %c0_i32_1 = arith.constant 0 : i32
    return %c0_i32, %c0_i32_0 : i32, i32
  }
  func.func @transform_4(%arg0: i32) -> (i32, i32) {
    %c0_i32 = arith.constant 0 : i32
    %c0_i32_0 = arith.constant 0 : i32
    %c0_i32_1 = arith.constant 0 : i32
    return %c0_i32, %c0_i32_0 : i32, i32
  }
  func.func @transform_5(%arg0: i32) -> (i32, i32) {
    %c0_i32 = arith.constant 0 : i32
    %c0_i32_0 = arith.constant 0 : i32
    %c0_i32_1 = arith.constant 0 : i32
    return %c0_i32, %c0_i32_0 : i32, i32
  }
  func.func @transform_6(%arg0: i32) -> i32 {
    %c0_i32 = arith.constant 0 : i32
    %c0_i32_0 = arith.constant 0 : i32
    return %c0_i32 : i32
  }
  func.func @transform_7(%arg0: i32) -> (i32, i32) {
    %c0_i32 = arith.constant 0 : i32
    %c0_i32_0 = arith.constant 0 : i32
    return %c0_i32, %arg0 : i32, i32
  }
}

</mosaic_0001>

<bundles_post_ra>
// kernel: v_approx_forward.1
= control target key start
LH: loop header
LB: loop body
LE: loop exit
PB: predicated region body
PF: predicated region fallthrough
CT: control target
= control target key end

     0   :  { %vm57_vm0 = vcmask 130048   ;;  %v457_v3 = vmov 0   ;;  %vm187_vm1 = vcmask 261120   ;;  %v458_v38 = vmov 0.0|0.0   ;;  %s573_s0 = inlined_call_operand.vmem [shape: f32[16,128], index: 0, kind: input, shape index: {}]   ;;  %s574_s1 = inlined_call_operand.vmem [shape: f32[32,16], index: 1, kind: input, shape index: {}]   ;;  %s575_s2 = inlined_call_operand.vmem [shape: f32[32,1], index: 2, kind: input, shape index: {}]   ;;  %s576_s4 = inlined_call_operand.vmem [shape: f32[32,1], index: 4, kind: input, shape index: {}]   ;;  %s577_s3 = inlined_call_operand.vmem [shape: f32[32,32], index: 3, kind: input, shape index: {}]   ;;  %s578_s5 = inlined_call_operand.vmem [shape: f32[1,32], index: 5, kind: input, shape index: {}]   ;;  %s579_s6 = inlined_call_operand.<no memory space> [shape: f32[1], index: 6, kind: input, shape index: {}]   ;;  %s580_s7 = inlined_call_operand.vmem [shape: f32[1,128], index: 7, kind: output, shape index: {}]  }
   0x1   :  { %v27_v0 = vld [vmem:[%s573_s0] sm:$0xff]  ;;  %v28_v1 = vld [vmem:[%s573_s0 + $0x8] sm:$0xff]  ;;  %455 = vset.pattern.permute.xlu0 %v457_v3  ;;  %456 = vset.pattern.permute.xlu1 %v457_v3  ;;  %v35_v6 = vld [vmem:[%s575_s2 + $0x10] sm:$0xff]  ;;  %vm459_vm2 = vmmov 0   ;;  %v460_v39 = vmov 0.0   ;;  %v291_v59 = vstv %s579_s6 }
   0x2   :  { %v29_v2 = vld [vmem:[%s574_s1] sm:$0xff]  ;;  %v433_v4 = vpack.c.bf16 %v28_v1, %v27_v0  ;;  %v30_v7 = vld [vmem:[%s574_s1 + $0x8] sm:$0xff]  ;;  %49 = vperm.xlu1 %456, %v35_v6   ;;  %v31_v9 = vld [vmem:[%s574_s1 + $0x10] sm:$0xff] }
   0x3   :  { %402 = vmatprep.mubr.msk.f32.mxu0 %vm57_vm0, %v29_v2  ;;  %v33_v5 = vld [vmem:[%s575_s2] sm:$0xff]  ;;  %v34_v8 = vld [vmem:[%s575_s2 + $0x8] sm:$0xff]  ;;  %v36_v10 = vld [vmem:[%s575_s2 + $0x18] sm:$0xff] }
   0x4   :  { %434 = vmatprep.subr.bf16.mxu0 %v433_v4  ;;  %39 = vperm.xlu0 %455, %v33_v5   ;;  %v32_v11 = vld [vmem:[%s574_s1 + $0x18] sm:$0xff]  ;;  %v163_v12 = vld [vmem:[%s576_s4] sm:$0xff]  ;;  %v164_v13 = vld [vmem:[%s576_s4 + $0x8] sm:$0xff] }
   0x5   :  { %436 = vmatpush3.bf16.msra.mxu0 %v433_v4  ;;  %v165_v14 = vld [vmem:[%s576_s4 + $0x10] sm:$0xff]  ;;  %v166_v15 = vld [vmem:[%s576_s4 + $0x18] sm:$0xff]  ;;  %v159_v16 = vld [vmem:[%s577_s3] sm:$0xff] }
   0x6   :  { %54 = vperm.xlu1 %456, %v36_v10   ;;  %416 = vmatprep.mubr.msk.f32.mxu1 %vm187_vm1, %v159_v16  ;;  %v160_v35 = vld [vmem:[%s577_s3 + $0x8] sm:$0xff]  ;;  %v161_v36 = vld [vmem:[%s577_s3 + $0x10] sm:$0xff]  ;;  %v162_v37 = vld [vmem:[%s577_s3 + $0x18] sm:$0xff] }
   0x7   :  { %445 = vmatprep.subr.bf16.mxu0 %v458_v38  ;;  %v289_v58 = vld [vmem:[%s578_s5] sm:$0x1] }
   0x8   :  { %403 = vmatmul.mubr.msk.f32.vlgmr.msra.gmra.mrb[0].mxu0 %vm57_vm0, %v30_v7  ;;  %44 = vperm.xlu0 %455, %v34_v8  }
   0x9   :  { %405 = vmatprep.mubr.msk.f32.mxu0 %vm57_vm0, %v31_v9 }
   0xa   :  { %174 = vperm.xlu1 %456, %v164_v13  }
   0xc   :  { %406 = vmatmul.mubr.msk.f32.gmra.mrb[2].mxu0 %vm57_vm0, %v32_v11  ;;  %169 = vperm.xlu0 %455, %v163_v12  }
   0xd   :  { %430 = vmatprep.mubr.msk.f32.mxu0 %vm459_vm2, %v460_v39 }
   0xe   :  { %184 = vperm.xlu1 %456, %v166_v15  }
  0x10   :  { %179 = vperm.xlu0 %455, %v165_v14  }
  0x81   :  { %v50_v18 = vpop.permute.xlu1 %49 }
  0x83   :  { %v40_v17 = vpop.permute.xlu0 %39 }
  0x85   :  { %v55_v25 = vpop.permute.xlu1 %54 }
  0x87   :  { %v45_v19 = vpop.permute.xlu0 %44 }
  0x89   :  { %v175_v40 = vpop.permute.xlu1 %174 }
  0x8b   :  { %v170_v41 = vpop.permute.xlu0 %169 }
  0x8d   :  { %v185_v47 = vpop.permute.xlu1 %184 }
  0x8f   :  { %v180_v50 = vpop.permute.xlu0 %179 }
  0xdb   :  { %v404_v20 = vpop.f32.mrb[0].mxu0 }
  0xdc   :  { %v142_v21 = vadd.f32 %v404_v20, %v45_v19  ;;  %v136_v22 = vpop.f32.mrb[1].mxu0 }
  0xdd   :  { %v137_v23 = vadd.f32 %v136_v22, %v40_v17 }
  0xde   :  { %v156_v24 = vmax.f32 %v142_v21, 0.0 }
  0xdf   :  { %v155_v26 = vmax.f32 %v137_v23, 0.0  ;;  %v407_v27 = vpop.f32.mrb[2].mxu0 }
  0xe0   :  { %v152_v28 = vadd.f32 %v407_v27, %v55_v25  ;;  %v146_v29 = vpop.f32.mrb[3].mxu0 }
  0xe1   :  { %v147_v30 = vadd.f32 %v146_v29, %v50_v18  ;;  %v437_v31 = vpack.c.bf16 %v156_v24, %v155_v26 }
  0xe2   :  { %v158_v32 = vmax.f32 %v152_v28, 0.0 }
  0xe3   :  { %v157_v33 = vmax.f32 %v147_v30, 0.0  ;;  %438 = vmatprep.subr.bf16.mxu1 %v437_v31 }
  0xe4   :  { %440 = vmatpush3.bf16.msra.mxu1 %v437_v31 }
  0xe5   :  { %v441_v34 = vpack.c.bf16 %v158_v32, %v157_v33 }
  0xe7   :  { %442 = vmatprep.subr.bf16.mxu1 %v441_v34 }
  0xe8   :  { %444 = vmatpush3.bf16.msra.mxu1 %v441_v34 }
  0xeb   :  { %417 = vmatmul.mubr.msk.f32.vlgmr.msra.gmra.mrb[0].mxu1 %vm187_vm1, %v160_v35 }
  0xec   :  { %419 = vmatprep.mubr.msk.f32.mxu1 %vm187_vm1, %v161_v36 }
  0xef   :  { %420 = vmatmul.mubr.msk.f32.gmra.mrb[2].mxu1 %vm187_vm1, %v162_v37 }
 0x1be   :  { %v418_v42 = vpop.f32.mrb[0].mxu1 }
 0x1bf   :  { %v272_v43 = vadd.f32 %v418_v42, %v175_v40  ;;  %v266_v44 = vpop.f32.mrb[1].mxu1 }
 0x1c0   :  { %v267_v45 = vadd.f32 %v266_v44, %v170_v41 }
 0x1c1   :  { %v286_v46 = vmax.f32 %v272_v43, 0.0 }
 0x1c2   :  { %v285_v48 = vmax.f32 %v267_v45, 0.0  ;;  %v421_v49 = vpop.f32.mrb[2].mxu1 }
 0x1c3   :  { %v282_v51 = vadd.f32 %v421_v49, %v185_v47  ;;  %v276_v52 = vpop.f32.mrb[3].mxu1 }
 0x1c4   :  { %v446_v53 = vpack.c.bf16 %v286_v46, %v285_v48  ;;  %v277_v54 = vadd.f32 %v276_v52, %v180_v50 }
 0x1c5   :  { %v288_v55 = vmax.f32 %v282_v51, 0.0 }
 0x1c6   :  { %v287_v56 = vmax.f32 %v277_v54, 0.0  ;;  %447 = vmatpush3.bf16.msra.mxu0 %v446_v53 }
 0x1c7   :  { %448 = vmatprep.subr.bf16.mxu0 %v458_v38 }
 0x1c8   :  { %v449_v57 = vpack.c.bf16 %v288_v55, %v287_v56 }
 0x1ca   :  { %450 = vmatpush3.bf16.msra.mxu0 %v449_v57 }
 0x1cd   :  { %431 = vmatmul.mubr.msk.f32.vlgmr.msra.gmra.mrb[4].mxu0 %vm187_vm1, %v289_v58 }
 0x2a0   :  { %v361_v60 = vpop.f32.mrb[4].mxu0 }
 0x2a1   :  { %v362_v61 = vadd.f32 %v361_v60, %v291_v59  ;;  %v432_v62 = vpop.f32.mrb[5].mxu0 }
 0x2a3   :  { %365 = vst [vmem:[%s580_s7] sm:$0x1] %v362_v61 }

</bundles_post_ra>
